<compile_context>
chip_gen: v5e
topology: v5e:2x2
jax: 0.10.0
libtpu: 0.0.40
codegen_flags: <defaults>
</compile_context>

<pallas_src>
import jax
import jax.numpy as jnp
from jax.experimental import pallas as pl
from jax.experimental.pallas import tpu as pltpu


def _round_up(x, m):
    return ((x + m - 1) // m) * m


def _make_decoder_kernel(num_layers):
    """Fused kernel: act = x; repeat {act = relu(act @ W[l] + b[l])}; write act."""

    def kernel(x_ref, w_ref, b_ref, o_ref):
        # x_ref: (M_pad, P)   w_ref: (L, P, P)   b_ref: (L, 1, P)   o_ref: (M_pad, P)
        act = x_ref[...]
        for l in range(num_layers):          # static unroll; L is tiny
            acc = jnp.dot(act, w_ref[l], preferred_element_type=jnp.float32)
            acc = acc + b_ref[l]             # (1, P) sublane-broadcast bias add (VPU)
            act = jnp.maximum(acc, 0.0)      # ReLU (dropout is identity in eval)
        o_ref[...] = act.astype(o_ref.dtype)

    return kernel


def init_decoder_params(key, hidden):
    """Deterministic synthetic parameters matching Decoder_s(hidden).

    PyTorch builds layers for i = len(hidden)-1 .. 1:  Linear(hidden[i], hidden[i-1]).
    We store each weight transposed: (in_features, out_features), so y = x @ W + b.
    """
    params = []
    for i in range(len(hidden) - 1, 0, -1):
        in_f, out_f = hidden[i], hidden[i - 1]
        key, kw, kb = jax.random.split(key, 3)
        bound = 1.0 / jnp.sqrt(jnp.float32(in_f))
        w = jax.random.uniform(kw, (in_f, out_f), jnp.float32, -bound, bound)
        b = jax.random.uniform(kb, (1, out_f), jnp.float32, -bound, bound)
        params.append((w, b))
    return params


def pack_decoder_params(params, lane=128):
    """Zero-pad every layer to a common lane-dense width P and stack.

    Returns (w_stack: (L, P, P), b_stack: (L, 1, P), out_features_of_last_layer).
    Zero padding guarantees padded output columns stay exactly 0 through ReLU.
    """
    max_dim = max(max(w.shape) for (w, _) in params)
    P = _round_up(max_dim, lane)
    L = len(params)
    w_stack = jnp.zeros((L, P, P), jnp.float32)
    b_stack = jnp.zeros((L, 1, P), jnp.float32)
    for l, (w, b) in enumerate(params):
        in_f, out_f = w.shape
        w_stack = w_stack.at[l, :in_f, :out_f].set(w)
        b_stack = b_stack.at[l, :1, :out_f].set(b)
    out_final = params[-1][0].shape[1]
    return w_stack, b_stack, out_final


def decoder_s_forward(x, packed):
    """Forward pass of Decoder_s as a single fused Pallas TPU kernel call."""
    w_stack, b_stack, out_final = packed
    L, P, _ = w_stack.shape
    M, K = x.shape
    M_pad = _round_up(max(M, 8), 8)

    # Lane/sublane-dense, zero-padded activation slab.
    x_pad = jnp.pad(x, ((0, M_pad - M), (0, P - K)))

    out = pl.pallas_call(
        _make_decoder_kernel(L),
        out_shape=jax.ShapeDtypeStruct((M_pad, P), x.dtype),
        in_specs=[
            pl.BlockSpec(memory_space=pltpu.MemorySpace.VMEM),  # x_pad
            pl.BlockSpec(memory_space=pltpu.MemorySpace.VMEM),  # w_stack
            pl.BlockSpec(memory_space=pltpu.MemorySpace.VMEM),  # b_stack
        ],
        out_specs=pl.BlockSpec(memory_space=pltpu.MemorySpace.VMEM),
    )(x_pad, w_stack, b_stack)

    return out[:M, :out_final]


def decoder_s_reference(x, params):
    """Pure-JAX reference (unpadded) for correctness checking."""
    for (w, b) in params:
        x = jnp.maximum(x @ w + b, 0.0)
    return x


if __name__ == "__main__":
    hidden = [32, 64, 128]   # Decoder_s maps hidden[-1] -> ... -> hidden[0]
    batch = 8

    key = jax.random.PRNGKey(0)
    key, kx = jax.random.split(key)
    x = jax.random.normal(kx, (batch, hidden[-1]), jnp.float32)

    params = init_decoder_params(key, hidden)
    packed = pack_decoder_params(params)

    out = decoder_s_forward(x, packed)
    out = jax.block_until_ready(out)

    ref = decoder_s_reference(x, params)
    assert out.shape == (batch, hidden[0]), out.shape
    assert jnp.allclose(out, ref, atol=1e-5, rtol=1e-5), "mismatch vs reference"

    print("KERNEL_OK")
</pallas_src>

<mosaic_0001>
module attributes {stable_mosaic.version = 11 : i64} {
  func.func @kernel(%arg0: memref<8x128xf32, #tpu.memory_space<vmem>>, %arg1: memref<2x128x128xf32, #tpu.memory_space<vmem>>, %arg2: memref<2x1x128xf32, #tpu.memory_space<vmem>>, %arg3: memref<8x128xf32, #tpu.memory_space<vmem>>) attributes {dimension_semantics = [], scalar_prefetch = 0 : i64, scratch_operands = 0 : i64, tpu.core_type = #tpu.core_type<tc>} {
    %c0 = arith.constant 0 : index
    %c0_0 = arith.constant 0 : index
    %0 = vector.load %arg0[%c0, %c0_0] : memref<8x128xf32, #tpu.memory_space<vmem>>, vector<8x128xf32>
    %c0_1 = arith.constant 0 : index
    %c0_2 = arith.constant 0 : index
    %c0_3 = arith.constant 0 : index
    %1 = vector.load %arg1[%c0_1, %c0_2, %c0_3] : memref<2x128x128xf32, #tpu.memory_space<vmem>>, vector<1x128x128xf32>
    %2 = vector.shape_cast %1 : vector<1x128x128xf32> to vector<128x128xf32>
    %cst = arith.constant dense<0.000000e+00> : vector<8x128xf32>
    %3 = tpu.matmul %0, %2, %cst {dimension_numbers = #tpu.dot_dimension_numbers<[1], [0], [0], [1], [0, 0, 1, 1], [], []>} : vector<8x128xf32>, vector<128x128xf32>, vector<8x128xf32> -> vector<8x128xf32>
    %c0_4 = arith.constant 0 : index
    %c0_5 = arith.constant 0 : index
    %c0_6 = arith.constant 0 : index
    %4 = vector.load %arg2[%c0_4, %c0_5, %c0_6] : memref<2x1x128xf32, #tpu.memory_space<vmem>>, vector<1x1x128xf32>
    %5 = vector.shape_cast %4 : vector<1x1x128xf32> to vector<1x128xf32>
    %6 = vector.broadcast %5 : vector<1x128xf32> to vector<8x128xf32>
    %7 = arith.addf %3, %6 : vector<8x128xf32>
    %cst_7 = arith.constant 0.000000e+00 : f32
    %8 = vector.broadcast %cst_7 : f32 to vector<8x128xf32>
    %9 = arith.maximumf %7, %8 : vector<8x128xf32>
    %c1 = arith.constant 1 : index
    %c0_8 = arith.constant 0 : index
    %c0_9 = arith.constant 0 : index
    %10 = vector.load %arg1[%c1, %c0_8, %c0_9] : memref<2x128x128xf32, #tpu.memory_space<vmem>>, vector<1x128x128xf32>
    %11 = vector.shape_cast %10 : vector<1x128x128xf32> to vector<128x128xf32>
    %cst_10 = arith.constant dense<0.000000e+00> : vector<8x128xf32>
    %12 = tpu.matmul %9, %11, %cst_10 {dimension_numbers = #tpu.dot_dimension_numbers<[1], [0], [0], [1], [0, 0, 1, 1], [], []>} : vector<8x128xf32>, vector<128x128xf32>, vector<8x128xf32> -> vector<8x128xf32>
    %c1_11 = arith.constant 1 : index
    %c0_12 = arith.constant 0 : index
    %c0_13 = arith.constant 0 : index
    %13 = vector.load %arg2[%c1_11, %c0_12, %c0_13] : memref<2x1x128xf32, #tpu.memory_space<vmem>>, vector<1x1x128xf32>
    %14 = vector.shape_cast %13 : vector<1x1x128xf32> to vector<1x128xf32>
    %15 = vector.broadcast %14 : vector<1x128xf32> to vector<8x128xf32>
    %16 = arith.addf %12, %15 : vector<8x128xf32>
    %cst_14 = arith.constant 0.000000e+00 : f32
    %17 = vector.broadcast %cst_14 : f32 to vector<8x128xf32>
    %18 = arith.maximumf %16, %17 : vector<8x128xf32>
    %c0_15 = arith.constant 0 : index
    %c0_16 = arith.constant 0 : index
    %19 = vector.load %arg3[%c0_15, %c0_16] : memref<8x128xf32, #tpu.memory_space<vmem>>, vector<8x128xf32>
    tpu.vector_store %arg3[%c0_15, %c0_16], %18 {strides = array<i32>} : memref<8x128xf32, #tpu.memory_space<vmem>>, vector<8x128xf32>,
    return
  }
}

</mosaic_0001>

<bundles_post_ra>
// kernel: tpu_custom_call.1
= control target key start
LH: loop header
LB: loop body
LE: loop exit
PB: predicated region body
PF: predicated region fallthrough
CT: control target
= control target key end

     0   :  { %8 = vsyncpa [#allocation3], 0  ;;  %s316_s0 = inlined_call_operand.hbm [shape: f32[8,128], index: 0, kind: input, shape index: {}]   ;;  %s317_s1 = inlined_call_operand.hbm [shape: f32[2,128,128], index: 1, kind: input, shape index: {}]   ;;  %s318_s2 = inlined_call_operand.hbm [shape: f32[2,1,128], index: 2, kind: input, shape index: {}]   ;;  %s319_s3 = inlined_call_operand.hbm [shape: f32[8,128], index: 3, kind: output, shape index: {}]  }
   0x1   :  { %9 = vsyncpa [#allocation6], 0  ;;  %s26_s14 = sshll.u32 %s317_s1, 4  ;;  %s27_s14 = int_to_ptr.hbm [resolvable:$true] %s26_s14 }
   0x2   :  { %10 = vsyncpa [#allocation4], 0  ;;  %s276_s15 = smov [#allocation5]   ;;  %s16_s19 = sshll.u32 %s316_s0, 4  ;;  %s17_s19 = int_to_ptr.hbm [resolvable:$true] %s16_s19 }
   0x3   :  { %s28_s16 = sshll.u32 %s276_s15, 4  ;;  %s277_s20 = smov 128   ;;  %s29_s16 = int_to_ptr.vmem [resolvable:$true] %s28_s16 }
   0x4   :  { %s278_s21 = smov 8   ;;  %s279_s22 = smov [#allocation2]  }
   0x5   :  { %34 = dma.hbm_to_vmem [thread:$0]  %s27_s14, 4096, %s29_s16, [#allocation6], %s277_s20, %s277_s20, %s278_s21  }
   0x6   :  { %s18_s23 = sshll.u32 %s279_s22, 4  ;;  %s39_s26 = sshll.u32 %s318_s2, 4  ;;  %s19_s23 = int_to_ptr.vmem [resolvable:$true] %s18_s23  ;;  %s40_s26 = int_to_ptr.hbm [resolvable:$true] %s39_s26 }
   0x7   :  { %21 = dma.hbm_to_vmem [thread:$0]  %s17_s19, 128, %s19_s23, [#allocation3]  }
   0x8   :  { %s280_s1 = smov [#allocation7]   ;;  %s281_s28 = smov 16  }
   0x9   :  { %s41_s27 = sshll.u32 %s280_s1, 4  ;;  %s282_s29 = smov 1   ;;  %s42_s27 = int_to_ptr.vmem [resolvable:$true] %s41_s27 }
   0xa   :  { %47 = dma.hbm_to_vmem [thread:$0]  %s40_s26, 32, %s42_s27, [#allocation6], %s281_s28, %s281_s28, %s282_s29  }
   0xb   :  { %270 = dma.done.wait [#allocation3], 128  }
   0xc   :  { %271 = vsyncadd [#allocation3], 4294967168 }
   0xd   :  { %272 = dma.done.wait [#allocation6], 4128  }
   0xe   :  { %273 = vsyncadd [#allocation6], 4294963168  ;;  %v76_v0 = vld [vmem:[#allocation5 + $0x78] sm:$0xff]  ;;  %v75_v1 = vld [vmem:[#allocation5 + $0x70] sm:$0xff]  ;;  %s283_s0 = smov [#allocation8]   ;;  %s153_s5 = sshll.u32 %s319_s3, 4  ;;  %s154_s5 = int_to_ptr.hbm [resolvable:$true] %s153_s5 }
   0xf   :  { %81 = vmatpush.msra.mxu0 %v76_v0  ;;  %v74_v2 = vld [vmem:[#allocation5 + $0x68] sm:$0xff]  ;;  %v73_v3 = vld [vmem:[#allocation5 + $0x60] sm:$0xff]  ;;  %v118_v4 = vld [vmem:[#allocation5 + $0xf8] sm:$0xff]  ;;  %s151_s2 = sshll.u32 %s283_s0, 4  ;;  %s152_s2 = int_to_ptr.vmem [resolvable:$true] %s151_s2 }
  0x10   :  { %v72_v5 = vld [vmem:[#allocation5 + $0x58] sm:$0xff]  ;;  %124 = vmatpush.msra.mxu1 %v118_v4  ;;  %v117_v6 = vld [vmem:[#allocation5 + $0xf0] sm:$0xff]  ;;  %v116_v7 = vld [vmem:[#allocation5 + $0xe8] sm:$0xff] }
  0x11   :  { %82 = vmatpush.msra.mxu0 %v75_v1  ;;  %v71_v8 = vld [vmem:[#allocation5 + $0x50] sm:$0xff]  ;;  %v115_v9 = vld [vmem:[#allocation5 + $0xe0] sm:$0xff]  ;;  %v70_v10 = vld [vmem:[#allocation5 + $0x48] sm:$0xff] }
  0x12   :  { %125 = vmatpush.msra.mxu1 %v117_v6  ;;  %v114_v11 = vld [vmem:[#allocation5 + $0xd8] sm:$0xff]  ;;  %v69_v12 = vld [vmem:[#allocation5 + $0x40] sm:$0xff]  ;;  %v113_v13 = vld [vmem:[#allocation5 + $0xd0] sm:$0xff] }
  0x13   :  { %83 = vmatpush.msra.mxu0 %v74_v2  ;;  %v68_v14 = vld [vmem:[#allocation5 + $0x38] sm:$0xff]  ;;  %v112_v15 = vld [vmem:[#allocation5 + $0xc8] sm:$0xff]  ;;  %v67_v16 = vld [vmem:[#allocation5 + $0x30] sm:$0xff] }
  0x14   :  { %126 = vmatpush.msra.mxu1 %v116_v7  ;;  %v111_v17 = vld [vmem:[#allocation5 + $0xc0] sm:$0xff]  ;;  %v66_v18 = vld [vmem:[#allocation5 + $0x28] sm:$0xff]  ;;  %v110_v19 = vld [vmem:[#allocation5 + $0xb8] sm:$0xff] }
  0x15   :  { %84 = vmatpush.msra.mxu0 %v73_v3  ;;  %v65_v20 = vld [vmem:[#allocation5 + $0x20] sm:$0xff]  ;;  %v109_v21 = vld [vmem:[#allocation5 + $0xb0] sm:$0xff]  ;;  %v64_v22 = vld [vmem:[#allocation5 + $0x18] sm:$0xff] }
  0x16   :  { %127 = vmatpush.msra.mxu1 %v115_v9  ;;  %v108_v23 = vld [vmem:[#allocation5 + $0xa8] sm:$0xff]  ;;  %v63_v24 = vld [vmem:[#allocation5 + $0x10] sm:$0xff]  ;;  %v107_v25 = vld [vmem:[#allocation5 + $0xa0] sm:$0xff] }
  0x17   :  { %85 = vmatpush.msra.mxu0 %v72_v5  ;;  %v62_v26 = vld [vmem:[#allocation5 + $0x8] sm:$0xff]  ;;  %v106_v27 = vld [vmem:[#allocation5 + $0x98] sm:$0xff]  ;;  %v61_v28 = vld [vmem:[#allocation5] sm:$0xff] }
  0x18   :  { %128 = vmatpush.msra.mxu1 %v114_v11  ;;  %v60_v29 = vld [vmem:[#allocation2] sm:$0xff]  ;;  %v105_v30 = vld [vmem:[#allocation5 + $0x90] sm:$0xff]  ;;  %v104_v31 = vld [vmem:[#allocation5 + $0x88] sm:$0xff] }
  0x19   :  { %86 = vmatpush.msra.mxu0 %v71_v8  ;;  %v103_v32 = vld [vmem:[#allocation5 + $0x80] sm:$0xff] }
  0x1a   :  { %129 = vmatpush.msra.mxu1 %v113_v13  ;;  %v172_v33 = vld [vmem:[#allocation7] ss:$0 sm:$0xff]  ;;  %v173_v37 = vld [vmem:[#allocation7 + $0x1] ss:$0 sm:$0xff] }
  0x1b   :  { %87 = vmatpush.msra.mxu0 %v70_v10 }
  0x1c   :  { %130 = vmatpush.msra.mxu1 %v112_v15 }
  0x1d   :  { %88 = vmatpush.msra.mxu0 %v69_v12 }
  0x1e   :  { %131 = vmatpush.msra.mxu1 %v111_v17 }
  0x1f   :  { %89 = vmatpush.msra.mxu0 %v68_v14 }
  0x20   :  { %132 = vmatpush.msra.mxu1 %v110_v19 }
  0x21   :  { %90 = vmatpush.msra.mxu0 %v67_v16 }
  0x22   :  { %133 = vmatpush.msra.mxu1 %v109_v21 }
  0x23   :  { %91 = vmatpush.msra.mxu0 %v66_v18 }
  0x24   :  { %134 = vmatpush.msra.mxu1 %v108_v23 }
  0x25   :  { %92 = vmatpush.msra.mxu0 %v65_v20 }
  0x26   :  { %135 = vmatpush.msra.mxu1 %v107_v25 }
  0x27   :  { %93 = vmatpush.msra.mxu0 %v64_v22 }
  0x28   :  { %136 = vmatpush.msra.mxu1 %v106_v27 }
  0x29   :  { %94 = vmatpush.msra.mxu0 %v63_v24 }
  0x2a   :  { %137 = vmatpush.msra.mxu1 %v105_v30 }
  0x2b   :  { %95 = vmatpush.msra.mxu0 %v62_v26 }
  0x2c   :  { %138 = vmatpush.msra.mxu1 %v104_v31 }
  0x2d   :  { %96 = vmatpush.msra.mxu0 %v61_v28 }
  0x2e   :  { %97 = vmatmul.f32.vlgmr.msra.gmra.mxu0 %v60_v29  ;;  %139 = vmatpush.msra.mxu1 %v103_v32 }
  0xab   :  { %v98_v34 = vpop.f32.mrf.mxu0 }
  0xac   :  { %v99_v35 = vadd.f32 %v172_v33, %v98_v34 }
  0xae   :  { %v101_v36 = vmax.f32 %v99_v35, 0.0 }
  0xb0   :  { %140 = vmatmul.f32.vlgmr.msra.gmra.mxu1 %v101_v36 }
 0x12d   :  { %v141_v38 = vpop.f32.mrf.mxu1 }
 0x12e   :  { %v142_v39 = vadd.f32 %v173_v37, %v141_v38 }
 0x130   :  { %v144_v40 = vmax.f32 %v142_v39, 0.0 }
 0x132   :  { %145 = vst [vmem:[#allocation8] sm:$0xff] %v144_v40 }
 0x133   :  { %156 = dma.vmem_to_hbm [thread:$0]  %s152_s2, 128, %s154_s5, [#allocation4]  }
 0x134   :  { %274 = dma.done.wait [#allocation4], 128  }
 0x135   :  { %275 = vsyncadd [#allocation4], 4294967168 }
 0x136   :  { %161 = vsyncpa [#allocation3], 1 }
 0x137   :  { %162 = vsyncpa [#allocation6], 1 }
 0x138   :  { %163 = vsyncpa [#allocation4], 1 }

</bundles_post_ra>
